<compile_context>
chip_gen: v6e
topology: v6e:2x2x1
jax: 0.10.0
libtpu: 0.0.40
codegen_flags: <defaults>
</compile_context>

<pallas_src>
import jax
import jax.numpy as jnp
from jax import lax
from jax.experimental import pallas as pl
from jax.experimental.pallas import tpu as pltpu


# ----------------------------------------------------------------------------
# Fused CSPBlock kernel
# ----------------------------------------------------------------------------
def csp_kernel(x_ref,                     # (nb, H+2, W*Ci)  pre-padded, bf16
               w1_ref, b1_ref,            # conv1 bands: (3, W*Ci, W*Co) bf16, (1, W*Co) f32
               wsc2_ref, bsc2_ref,        # [skip_conv | conv2] fused: (3, W*Co, 2*W*Co), (1, 2*W*Co)
               w3_ref, b3_ref,            # conv3 bands
               o_ref,                     # (nb, 2, H, W*Co) f32; [:,0]=conv3, [:,1]=skip
               y1pad_ref, y2pad_ref):     # (nb*(H+2), W*Co) bf16 padded activation slabs
    nb, Hp, _ = x_ref.shape
    H = Hp - 2
    P = nb * Hp
    WCo = o_ref.shape[-1]

    def leaky(v):
        return jnp.where(v >= 0, v, 0.1 * v)      # LeakyReLU(0.1)

    # Zero only the per-image H-padding rows of the scratch slabs (interiors
    # are fully overwritten below).  Done every grid step — it is just 4*nb
    # single-row stores — so the kernel is megacore-safe (no reliance on
    # program_id==0 having run on this core).
    zrow = jnp.zeros((1, WCo), y1pad_ref.dtype)
    for i in range(nb):
        base = i * Hp
        y1pad_ref[base:base + 1, :] = zrow
        y1pad_ref[base + H + 1:base + H + 2, :] = zrow
        y2pad_ref[base:base + 1, :] = zrow
        y2pad_ref[base + H + 1:base + H + 2, :] = zrow

    # --- conv1: per image, straight off the already H-padded input block
    # (no xpad scratch, no VMEM->VMEM copy).  One matmul per kernel row;
    # W-boundary zeros are baked into the banded weights.
    for i in range(nb):
        xi = x_ref[i]                                          # (H+2, W*Ci) bf16
        a = jnp.dot(xi[0:H, :], w1_ref[0], preferred_element_type=jnp.float32)
        a = a + jnp.dot(xi[1:H + 1, :], w1_ref[1], preferred_element_type=jnp.float32)
        a = a + jnp.dot(xi[2:H + 2, :], w1_ref[2], preferred_element_type=jnp.float32)
        y1 = leaky(a + b1_ref[...])                            # folded-BN bias
        base = i * Hp
        y1pad_ref[base + 1:base + H + 1, :] = y1.astype(y1pad_ref.dtype)

    def band_conv(src_ref, w_ref, b_ref):
        # src_ref: (P, K) padded slab holding nb images.  Band matmuls over the
        # WHOLE slab (M = P-2) to fill the MXU rows; rows at inter-image pad
        # positions come out as garbage and are simply never stored.
        a = jnp.dot(src_ref[0:P - 2, :], w_ref[0], preferred_element_type=jnp.float32)
        a = a + jnp.dot(src_ref[1:P - 1, :], w_ref[1], preferred_element_type=jnp.float32)
        a = a + jnp.dot(src_ref[2:P, :], w_ref[2], preferred_element_type=jnp.float32)
        return leaky(a + b_ref[...])                           # (P-2, n_out) f32

    # --- skip_conv + conv2 fused along the output axis (n = 2*W*Co = 256).
    y12 = band_conv(y1pad_ref, wsc2_ref, bsc2_ref)
    skip = y12[:, :WCo]
    x2 = y12[:, WCo:]
    for i in range(nb):
        base = i * Hp
        o_ref[i, 1, :, :] = skip[base:base + H, :]             # second channel half
        y2pad_ref[base + 1:base + H + 1, :] = x2[base:base + H, :].astype(y2pad_ref.dtype)

    # --- conv3 on the x2 slab -> first channel half of the output.
    y3 = band_conv(y2pad_ref, w3_ref, b3_ref)
    for i in range(nb):
        base = i * Hp
        o_ref[i, 0, :, :] = y3[base:base + H, :]


# ----------------------------------------------------------------------------
# Weight packing helpers
# ----------------------------------------------------------------------------
def _banded_conv_weights(w_hwio, scale, W):
    """Fold BN scale into the conv weights and lay them out as three banded
    matrices B[dy] of shape (W*Cin, W*Cout): a padded, lane-packed activation
    row (length W*Cin) matmuls directly to an output row (length W*Cout).
    W-boundary zero padding is encoded by omitting out-of-range bands."""
    KH, KW, Ci, Co = w_hwio.shape
    wf = (w_hwio * scale.reshape(1, 1, 1, Co)).astype(jnp.float32)
    idx = jnp.arange(W)
    bands = []
    for dy in range(KH):
        T = jnp.zeros((W, Ci, W, Co), jnp.float32)
        for dx in range(KW):
            w_in = idx + dx - 1                                   # input col per output col
            valid = (w_in >= 0) & (w_in < W)
            sel = (idx[:, None] == w_in[None, :]) & valid[None, :]  # (W_in, W_out)
            T = T + sel[:, None, :, None].astype(jnp.float32) * \
                wf[dy, dx][None, :, None, :]
        bands.append(T.reshape(W * Ci, W * Co))
    return jnp.stack(bands, axis=0)                               # (3, W*Ci, W*Co)


def _tiled_bias(bias, W):
    return jnp.tile(bias, W).reshape(1, W * bias.shape[0])        # f32, per-lane


# ----------------------------------------------------------------------------
# Wrapper
# ----------------------------------------------------------------------------
def csp_block(x_nchw, params, *, nb=None):
    N, Cin, H, W = x_nchw.shape
    Co = params["conv1"]["w"].shape[-1]
    WCi, WCo = W * Cin, W * Co

    if nb is None:
        # Fold batch into the matmul M dimension (fill the 128/256-row MXU),
        # but keep >= 2 grid steps so both v7x TensorCores get work.
        nb = 1
        while (2 * nb * (H + 2) <= 256
               and N % (2 * nb) == 0
               and N // (2 * nb) >= 2):
            nb *= 2
    assert N % nb == 0, (N, nb)

    # NCHW -> lane-packed, H-padded bf16 (N, H+2, W*Cin); one fused XLA copy.
    # W-boundary padding is baked into the banded weights, not materialized.
    x = jnp.transpose(x_nchw, (0, 2, 3, 1)).reshape(N, H, WCi)
    x = jnp.pad(x, ((0, 0), (1, 1), (0, 0))).astype(jnp.bfloat16)

    p1, ps, p2, p3 = (params[k] for k in ("conv1", "skip_conv", "conv2", "conv3"))
    w1 = _banded_conv_weights(p1["w"], p1["scale"], W).astype(jnp.bfloat16)
    b1 = _tiled_bias(p1["bias"], W)
    # skip_conv and conv2 share their input (x1): fuse along the output axis.
    wsc2 = jnp.concatenate(
        [_banded_conv_weights(ps["w"], ps["scale"], W),
         _banded_conv_weights(p2["w"], p2["scale"], W)], axis=-1).astype(jnp.bfloat16)
    bsc2 = jnp.concatenate([_tiled_bias(ps["bias"], W), _tiled_bias(p2["bias"], W)], axis=-1)
    w3 = _banded_conv_weights(p3["w"], p3["scale"], W).astype(jnp.bfloat16)
    b3 = _tiled_bias(p3["bias"], W)

    out = pl.pallas_call(
        csp_kernel,
        out_shape=jax.ShapeDtypeStruct((N, 2, H, WCo), jnp.float32),
        grid_spec=pltpu.PrefetchScalarGridSpec(
            num_scalar_prefetch=0,
            grid=(N // nb,),                                  # nb images per grid step
            in_specs=[
                pl.BlockSpec((nb, H + 2, WCi), lambda n: (n, 0, 0)),
                pl.BlockSpec(w1.shape, lambda n: (0, 0, 0)),  # weights: grid-invariant
                pl.BlockSpec(b1.shape, lambda n: (0, 0)),
                pl.BlockSpec(wsc2.shape, lambda n: (0, 0, 0)),
                pl.BlockSpec(bsc2.shape, lambda n: (0, 0)),
                pl.BlockSpec(w3.shape, lambda n: (0, 0, 0)),
                pl.BlockSpec(b3.shape, lambda n: (0, 0)),
            ],
            out_specs=pl.BlockSpec((nb, 2, H, WCo), lambda n: (n, 0, 0, 0)),
            scratch_shapes=[
                pltpu.VMEM((nb * (H + 2), WCo), jnp.bfloat16),   # padded x1 slab
                pltpu.VMEM((nb * (H + 2), WCo), jnp.bfloat16),   # padded x2 slab
            ],
        ),
        compiler_params=pltpu.CompilerParams(
            dimension_semantics=("parallel",),      # shard batch blocks over 2 TCs (v7x)
            vmem_limit_bytes=32 * 1024 * 1024,      # re-derive if H/W/C or nb grow (v7x: 64 MiB)
        ),
    )(x, w1, b1, wsc2, bsc2, w3, b3)

    # (N, 2, H, W, Co) lane-dense -> NCHW with channels [conv3 | skip]
    # (== torch.cat(dim=1)).
    # TODO(synk): in a real pipeline keep the lane-dense (H, W*C) layout
    # end-to-end; this NCHW transpose is a separate sub-128-lane XLA pass.
    return out.reshape(N, 2, H, W, Co).transpose(0, 1, 4, 2, 3).reshape(N, 2 * Co, H, W)


# ----------------------------------------------------------------------------
# Deterministic synthetic parameters (shapes follow the torch module __init__)
# ----------------------------------------------------------------------------
def make_convblock_params(key, cin, cout, eps=1e-5):
    kw, kg, kb, km, kv = jax.random.split(key, 5)
    w = jax.random.normal(kw, (3, 3, cin, cout), jnp.float32) * 0.1   # HWIO
    gamma = jax.random.uniform(kg, (cout,), jnp.float32, 0.5, 1.5)
    beta = jax.random.normal(kb, (cout,), jnp.float32) * 0.1
    run_mean = jax.random.normal(km, (cout,), jnp.float32) * 0.1
    run_var = jax.random.uniform(kv, (cout,), jnp.float32, 0.5, 1.5)
    scale = gamma / jnp.sqrt(run_var + eps)                   # folded eval-mode BN
    bias = beta - run_mean * scale
    return {"w": w, "scale": scale, "bias": bias}


def make_csp_params(key, in_channels, out_channels):
    k1, k2, k3, k4 = jax.random.split(key, 4)
    return {
        "conv1": make_convblock_params(k1, in_channels, out_channels),
        "conv2": make_convblock_params(k2, out_channels, out_channels),
        "conv3": make_convblock_params(k3, out_channels, out_channels),
        "skip_conv": make_convblock_params(k4, out_channels, out_channels),
    }


# ----------------------------------------------------------------------------
# Pure-JAX f32 reference (for correctness check)
# ----------------------------------------------------------------------------
def convblock_ref(x_nhwc, params):
    y = lax.conv_general_dilated(
        x_nhwc, params["w"], window_strides=(1, 1), padding="SAME",
        dimension_numbers=("NHWC", "HWIO", "NHWC"),
        precision=lax.Precision.HIGHEST)
    y = y * params["scale"].reshape(1, 1, 1, -1) + params["bias"].reshape(1, 1, 1, -1)
    return jnp.where(y >= 0, y, 0.1 * y)


def csp_block_ref(x_nchw, params):
    x = jnp.transpose(x_nchw, (0, 2, 3, 1)).astype(jnp.float32)
    x1 = convblock_ref(x, params["conv1"])
    skip = convblock_ref(x1, params["skip_conv"])
    x2 = convblock_ref(x1, params["conv2"])
    x3 = convblock_ref(x2, params["conv3"])
    out = jnp.concatenate([x3, skip], axis=-1)
    return jnp.transpose(out, (0, 3, 1, 2))


if __name__ == "__main__":
    N, Cin, H, W = 2, 4, 16, 16
    Cout = 8

    key = jax.random.PRNGKey(0)
    kx, kp = jax.random.split(key)
    x = jax.random.normal(kx, (N, Cin, H, W), jnp.float32)    # NCHW like torch
    params = make_csp_params(kp, Cin, Cout)

    out = jax.block_until_ready(jax.jit(csp_block)(x, params))
    ref = jax.block_until_ready(csp_block_ref(x, params))

    assert out.shape == (N, 2 * Cout, H, W), out.shape
    max_err = float(jnp.max(jnp.abs(out - ref)))
    # bf16 MXU operands with f32 accumulation: tolerance relaxed vs. f32 ref.
    assert jnp.allclose(out, ref, atol=5e-2, rtol=5e-2), max_err
    print("KERNEL_OK")
</pallas_src>

<mosaic_0001>
module attributes {stable_mosaic.version = 11 : i64} {
  func.func @csp_kernel(%arg0: i32, %arg1: memref<1x18x64xbf16, #tpu.memory_space<vmem>>, %arg2: memref<3x64x128xbf16, #tpu.memory_space<vmem>>, %arg3: memref<1x128xf32, #tpu.memory_space<vmem>>, %arg4: memref<3x128x256xbf16, #tpu.memory_space<vmem>>, %arg5: memref<1x256xf32, #tpu.memory_space<vmem>>, %arg6: memref<3x128x128xbf16, #tpu.memory_space<vmem>>, %arg7: memref<1x128xf32, #tpu.memory_space<vmem>>, %arg8: memref<1x2x16x128xf32, #tpu.memory_space<vmem>>, %arg9: memref<18x128xbf16, #tpu.memory_space<vmem>>, %arg10: memref<18x128xbf16, #tpu.memory_space<vmem>>) attributes {dimension_semantics = [#tpu.dimension_semantics<parallel>], iteration_bounds = array<i64: 2>, scalar_prefetch = 0 : i64, scratch_operands = 2 : i64, tpu.core_type = #tpu.core_type<tc>, window_params = [{transform_indices = @transform_0, window_bounds = array<i64: 1, 18, 64>}, {pipeline_mode = #tpu.pipeline_mode<synchronous>, transform_indices = @transform_1, window_bounds = array<i64: 3, 64, 128>}, {pipeline_mode = #tpu.pipeline_mode<synchronous>, transform_indices = @transform_2, window_bounds = array<i64: 1, 128>}, {pipeline_mode = #tpu.pipeline_mode<synchronous>, transform_indices = @transform_3, window_bounds = array<i64: 3, 128, 256>}, {pipeline_mode = #tpu.pipeline_mode<synchronous>, transform_indices = @transform_4, window_bounds = array<i64: 1, 256>}, {pipeline_mode = #tpu.pipeline_mode<synchronous>, transform_indices = @transform_5, window_bounds = array<i64: 3, 128, 128>}, {pipeline_mode = #tpu.pipeline_mode<synchronous>, transform_indices = @transform_6, window_bounds = array<i64: 1, 128>}, {transform_indices = @transform_7, window_bounds = array<i64: 1, 2, 16, 128>}]} {
    %cst = arith.constant 0.000000e+00 : bf16
    %0 = vector.broadcast %cst : bf16 to vector<1x128xbf16>
    %c0 = arith.constant 0 : index
    %c0_0 = arith.constant 0 : index
    %1 = vector.load %arg9[%c0, %c0_0] : memref<18x128xbf16, #tpu.memory_space<vmem>>, vector<1x128xbf16>
    tpu.vector_store %arg9[%c0, %c0_0], %0 {strides = array<i32>} : memref<18x128xbf16, #tpu.memory_space<vmem>>, vector<1x128xbf16>,
    %c17 = arith.constant 17 : index
    %c0_1 = arith.constant 0 : index
    %2 = vector.load %arg9[%c17, %c0_1] : memref<18x128xbf16, #tpu.memory_space<vmem>>, vector<1x128xbf16>
    tpu.vector_store %arg9[%c17, %c0_1], %0 {strides = array<i32>} : memref<18x128xbf16, #tpu.memory_space<vmem>>, vector<1x128xbf16>,
    %c0_2 = arith.constant 0 : index
    %c0_3 = arith.constant 0 : index
    %3 = vector.load %arg10[%c0_2, %c0_3] : memref<18x128xbf16, #tpu.memory_space<vmem>>, vector<1x128xbf16>
    tpu.vector_store %arg10[%c0_2, %c0_3], %0 {strides = array<i32>} : memref<18x128xbf16, #tpu.memory_space<vmem>>, vector<1x128xbf16>,
    %c17_4 = arith.constant 17 : index
    %c0_5 = arith.constant 0 : index
    %4 = vector.load %arg10[%c17_4, %c0_5] : memref<18x128xbf16, #tpu.memory_space<vmem>>, vector<1x128xbf16>
    tpu.vector_store %arg10[%c17_4, %c0_5], %0 {strides = array<i32>} : memref<18x128xbf16, #tpu.memory_space<vmem>>, vector<1x128xbf16>,
    %c0_6 = arith.constant 0 : index
    %c0_7 = arith.constant 0 : index
    %c0_8 = arith.constant 0 : index
    %5 = vector.load %arg1[%c0_6, %c0_7, %c0_8] : memref<1x18x64xbf16, #tpu.memory_space<vmem>>, vector<1x18x64xbf16>
    %6 = vector.shape_cast %5 : vector<1x18x64xbf16> to vector<18x64xbf16>
    %7 = vector.extract_strided_slice %6 {offsets = [0, 0], sizes = [16, 64], strides = [1, 1]} : vector<18x64xbf16> to vector<16x64xbf16>
    %c0_9 = arith.constant 0 : index
    %c0_10 = arith.constant 0 : index
    %c0_11 = arith.constant 0 : index
    %8 = vector.load %arg2[%c0_9, %c0_10, %c0_11] : memref<3x64x128xbf16, #tpu.memory_space<vmem>>, vector<1x64x128xbf16>
    %9 = vector.shape_cast %8 : vector<1x64x128xbf16> to vector<64x128xbf16>
    %cst_12 = arith.constant dense<0.000000e+00> : vector<16x128xf32>
    %10 = tpu.matmul %7, %9, %cst_12 {dimension_numbers = #tpu.dot_dimension_numbers<[1], [0], [0], [1], [0, 0, 1, 1], [], []>} : vector<16x64xbf16>, vector<64x128xbf16>, vector<16x128xf32> -> vector<16x128xf32>
    %11 = vector.extract_strided_slice %6 {offsets = [1, 0], sizes = [16, 64], strides = [1, 1]} : vector<18x64xbf16> to vector<16x64xbf16>
    %c1 = arith.constant 1 : index
    %c0_13 = arith.constant 0 : index
    %c0_14 = arith.constant 0 : index
    %12 = vector.load %arg2[%c1, %c0_13, %c0_14] : memref<3x64x128xbf16, #tpu.memory_space<vmem>>, vector<1x64x128xbf16>
    %13 = vector.shape_cast %12 : vector<1x64x128xbf16> to vector<64x128xbf16>
    %cst_15 = arith.constant dense<0.000000e+00> : vector<16x128xf32>
    %14 = tpu.matmul %11, %13, %cst_15 {dimension_numbers = #tpu.dot_dimension_numbers<[1], [0], [0], [1], [0, 0, 1, 1], [], []>} : vector<16x64xbf16>, vector<64x128xbf16>, vector<16x128xf32> -> vector<16x128xf32>
    %15 = arith.addf %10, %14 : vector<16x128xf32>
    %16 = vector.extract_strided_slice %6 {offsets = [2, 0], sizes = [16, 64], strides = [1, 1]} : vector<18x64xbf16> to vector<16x64xbf16>
    %c2 = arith.constant 2 : index
    %c0_16 = arith.constant 0 : index
    %c0_17 = arith.constant 0 : index
    %17 = vector.load %arg2[%c2, %c0_16, %c0_17] : memref<3x64x128xbf16, #tpu.memory_space<vmem>>, vector<1x64x128xbf16>
    %18 = vector.shape_cast %17 : vector<1x64x128xbf16> to vector<64x128xbf16>
    %cst_18 = arith.constant dense<0.000000e+00> : vector<16x128xf32>
    %19 = tpu.matmul %16, %18, %cst_18 {dimension_numbers = #tpu.dot_dimension_numbers<[1], [0], [0], [1], [0, 0, 1, 1], [], []>} : vector<16x64xbf16>, vector<64x128xbf16>, vector<16x128xf32> -> vector<16x128xf32>
    %20 = arith.addf %15, %19 : vector<16x128xf32>
    %c0_19 = arith.constant 0 : index
    %c0_20 = arith.constant 0 : index
    %21 = vector.load %arg3[%c0_19, %c0_20] : memref<1x128xf32, #tpu.memory_space<vmem>>, vector<1x128xf32>
    %22 = vector.broadcast %21 : vector<1x128xf32> to vector<16x128xf32>
    %23 = arith.addf %20, %22 : vector<16x128xf32>
    %cst_21 = arith.constant 0.000000e+00 : f32
    %24 = vector.broadcast %cst_21 : f32 to vector<16x128xf32>
    %25 = arith.cmpf oge, %23, %24 : vector<16x128xf32>
    %cst_22 = arith.constant 1.000000e-01 : f32
    %26 = vector.broadcast %cst_22 : f32 to vector<16x128xf32>
    %27 = arith.mulf %26, %23 : vector<16x128xf32>
    %28 = arith.select %25, %23, %27 : vector<16x128xi1>, vector<16x128xf32>
    %29 = arith.truncf %28 : vector<16x128xf32> to vector<16x128xbf16>
    %c1_23 = arith.constant 1 : index
    %c0_24 = arith.constant 0 : index
    %30 = vector.load %arg9[%c1_23, %c0_24] : memref<18x128xbf16, #tpu.memory_space<vmem>>, vector<16x128xbf16>
    tpu.vector_store %arg9[%c1_23, %c0_24], %29 {strides = array<i32>} : memref<18x128xbf16, #tpu.memory_space<vmem>>, vector<16x128xbf16>,
    %c0_25 = arith.constant 0 : index
    %c0_26 = arith.constant 0 : index
    %31 = vector.load %arg9[%c0_25, %c0_26] : memref<18x128xbf16, #tpu.memory_space<vmem>>, vector<16x128xbf16>
    %c0_27 = arith.constant 0 : index
    %c0_28 = arith.constant 0 : index
    %c0_29 = arith.constant 0 : index
    %32 = vector.load %arg4[%c0_27, %c0_28, %c0_29] : memref<3x128x256xbf16, #tpu.memory_space<vmem>>, vector<1x128x256xbf16>
    %33 = vector.shape_cast %32 : vector<1x128x256xbf16> to vector<128x256xbf16>
    %cst_30 = arith.constant dense<0.000000e+00> : vector<16x256xf32>
    %34 = tpu.matmul %31, %33, %cst_30 {dimension_numbers = #tpu.dot_dimension_numbers<[1], [0], [0], [1], [0, 0, 1, 1], [], []>} : vector<16x128xbf16>, vector<128x256xbf16>, vector<16x256xf32> -> vector<16x256xf32>
    %c1_31 = arith.constant 1 : index
    %c0_32 = arith.constant 0 : index
    %35 = vector.load %arg9[%c1_31, %c0_32] : memref<18x128xbf16, #tpu.memory_space<vmem>>, vector<16x128xbf16>
    %c1_33 = arith.constant 1 : index
    %c0_34 = arith.constant 0 : index
    %c0_35 = arith.constant 0 : index
    %36 = vector.load %arg4[%c1_33, %c0_34, %c0_35] : memref<3x128x256xbf16, #tpu.memory_space<vmem>>, vector<1x128x256xbf16>
    %37 = vector.shape_cast %36 : vector<1x128x256xbf16> to vector<128x256xbf16>
    %cst_36 = arith.constant dense<0.000000e+00> : vector<16x256xf32>
    %38 = tpu.matmul %35, %37, %cst_36 {dimension_numbers = #tpu.dot_dimension_numbers<[1], [0], [0], [1], [0, 0, 1, 1], [], []>} : vector<16x128xbf16>, vector<128x256xbf16>, vector<16x256xf32> -> vector<16x256xf32>
    %39 = arith.addf %34, %38 : vector<16x256xf32>
    %c2_37 = arith.constant 2 : index
    %c0_38 = arith.constant 0 : index
    %40 = vector.load %arg9[%c2_37, %c0_38] : memref<18x128xbf16, #tpu.memory_space<vmem>>, vector<16x128xbf16>
    %c2_39 = arith.constant 2 : index
    %c0_40 = arith.constant 0 : index
    %c0_41 = arith.constant 0 : index
    %41 = vector.load %arg4[%c2_39, %c0_40, %c0_41] : memref<3x128x256xbf16, #tpu.memory_space<vmem>>, vector<1x128x256xbf16>
    %42 = vector.shape_cast %41 : vector<1x128x256xbf16> to vector<128x256xbf16>
    %cst_42 = arith.constant dense<0.000000e+00> : vector<16x256xf32>
    %43 = tpu.matmul %40, %42, %cst_42 {dimension_numbers = #tpu.dot_dimension_numbers<[1], [0], [0], [1], [0, 0, 1, 1], [], []>} : vector<16x128xbf16>, vector<128x256xbf16>, vector<16x256xf32> -> vector<16x256xf32>
    %44 = arith.addf %39, %43 : vector<16x256xf32>
    %c0_43 = arith.constant 0 : index
    %c0_44 = arith.constant 0 : index
    %45 = vector.load %arg5[%c0_43, %c0_44] : memref<1x256xf32, #tpu.memory_space<vmem>>, vector<1x256xf32>
    %46 = vector.broadcast %45 : vector<1x256xf32> to vector<16x256xf32>
    %47 = arith.addf %44, %46 : vector<16x256xf32>
    %cst_45 = arith.constant 0.000000e+00 : f32
    %48 = vector.broadcast %cst_45 : f32 to vector<16x256xf32>
    %49 = arith.cmpf oge, %47, %48 : vector<16x256xf32>
    %cst_46 = arith.constant 1.000000e-01 : f32
    %50 = vector.broadcast %cst_46 : f32 to vector<16x256xf32>
    %51 = arith.mulf %50, %47 : vector<16x256xf32>
    %52 = arith.select %49, %47, %51 : vector<16x256xi1>, vector<16x256xf32>
    %53 = vector.extract_strided_slice %52 {offsets = [0, 0], sizes = [16, 128], strides = [1, 1]} : vector<16x256xf32> to vector<16x128xf32>
    %54 = vector.extract_strided_slice %52 {offsets = [0, 128], sizes = [16, 128], strides = [1, 1]} : vector<16x256xf32> to vector<16x128xf32>
    %c0_47 = arith.constant 0 : index
    %c1_48 = arith.constant 1 : index
    %c0_49 = arith.constant 0 : index
    %c0_50 = arith.constant 0 : index
    %55 = vector.load %arg8[%c0_47, %c1_48, %c0_49, %c0_50] : memref<1x2x16x128xf32, #tpu.memory_space<vmem>>, vector<1x1x16x128xf32>
    %56 = vector.shape_cast %55 : vector<1x1x16x128xf32> to vector<16x128xf32>
    %57 = vector.shape_cast %53 : vector<16x128xf32> to vector<1x1x16x128xf32>
    tpu.vector_store %arg8[%c0_47, %c1_48, %c0_49, %c0_50], %57 {strides = array<i32>} : memref<1x2x16x128xf32, #tpu.memory_space<vmem>>, vector<1x1x16x128xf32>,
    %58 = arith.truncf %54 : vector<16x128xf32> to vector<16x128xbf16>
    %c1_51 = arith.constant 1 : index
    %c0_52 = arith.constant 0 : index
    %59 = vector.load %arg10[%c1_51, %c0_52] : memref<18x128xbf16, #tpu.memory_space<vmem>>, vector<16x128xbf16>
    tpu.vector_store %arg10[%c1_51, %c0_52], %58 {strides = array<i32>} : memref<18x128xbf16, #tpu.memory_space<vmem>>, vector<16x128xbf16>,
    %c0_53 = arith.constant 0 : index
    %c0_54 = arith.constant 0 : index
    %60 = vector.load %arg10[%c0_53, %c0_54] : memref<18x128xbf16, #tpu.memory_space<vmem>>, vector<16x128xbf16>
    %c0_55 = arith.constant 0 : index
    %c0_56 = arith.constant 0 : index
    %c0_57 = arith.constant 0 : index
    %61 = vector.load %arg6[%c0_55, %c0_56, %c0_57] : memref<3x128x128xbf16, #tpu.memory_space<vmem>>, vector<1x128x128xbf16>
    %62 = vector.shape_cast %61 : vector<1x128x128xbf16> to vector<128x128xbf16>
    %cst_58 = arith.constant dense<0.000000e+00> : vector<16x128xf32>
    %63 = tpu.matmul %60, %62, %cst_58 {dimension_numbers = #tpu.dot_dimension_numbers<[1], [0], [0], [1], [0, 0, 1, 1], [], []>} : vector<16x128xbf16>, vector<128x128xbf16>, vector<16x128xf32> -> vector<16x128xf32>
    %c1_59 = arith.constant 1 : index
    %c0_60 = arith.constant 0 : index
    %64 = vector.load %arg10[%c1_59, %c0_60] : memref<18x128xbf16, #tpu.memory_space<vmem>>, vector<16x128xbf16>
    %c1_61 = arith.constant 1 : index
    %c0_62 = arith.constant 0 : index
    %c0_63 = arith.constant 0 : index
    %65 = vector.load %arg6[%c1_61, %c0_62, %c0_63] : memref<3x128x128xbf16, #tpu.memory_space<vmem>>, vector<1x128x128xbf16>
    %66 = vector.shape_cast %65 : vector<1x128x128xbf16> to vector<128x128xbf16>
    %cst_64 = arith.constant dense<0.000000e+00> : vector<16x128xf32>
    %67 = tpu.matmul %64, %66, %cst_64 {dimension_numbers = #tpu.dot_dimension_numbers<[1], [0], [0], [1], [0, 0, 1, 1], [], []>} : vector<16x128xbf16>, vector<128x128xbf16>, vector<16x128xf32> -> vector<16x128xf32>
    %68 = arith.addf %63, %67 : vector<16x128xf32>
    %c2_65 = arith.constant 2 : index
    %c0_66 = arith.constant 0 : index
    %69 = vector.load %arg10[%c2_65, %c0_66] : memref<18x128xbf16, #tpu.memory_space<vmem>>, vector<16x128xbf16>
    %c2_67 = arith.constant 2 : index
    %c0_68 = arith.constant 0 : index
    %c0_69 = arith.constant 0 : index
    %70 = vector.load %arg6[%c2_67, %c0_68, %c0_69] : memref<3x128x128xbf16, #tpu.memory_space<vmem>>, vector<1x128x128xbf16>
    %71 = vector.shape_cast %70 : vector<1x128x128xbf16> to vector<128x128xbf16>
    %cst_70 = arith.constant dense<0.000000e+00> : vector<16x128xf32>
    %72 = tpu.matmul %69, %71, %cst_70 {dimension_numbers = #tpu.dot_dimension_numbers<[1], [0], [0], [1], [0, 0, 1, 1], [], []>} : vector<16x128xbf16>, vector<128x128xbf16>, vector<16x128xf32> -> vector<16x128xf32>
    %73 = arith.addf %68, %72 : vector<16x128xf32>
    %c0_71 = arith.constant 0 : index
    %c0_72 = arith.constant 0 : index
    %74 = vector.load %arg7[%c0_71, %c0_72] : memref<1x128xf32, #tpu.memory_space<vmem>>, vector<1x128xf32>
    %75 = vector.broadcast %74 : vector<1x128xf32> to vector<16x128xf32>
    %76 = arith.addf %73, %75 : vector<16x128xf32>
    %cst_73 = arith.constant 0.000000e+00 : f32
    %77 = vector.broadcast %cst_73 : f32 to vector<16x128xf32>
    %78 = arith.cmpf oge, %76, %77 : vector<16x128xf32>
    %cst_74 = arith.constant 1.000000e-01 : f32
    %79 = vector.broadcast %cst_74 : f32 to vector<16x128xf32>
    %80 = arith.mulf %79, %76 : vector<16x128xf32>
    %81 = arith.select %78, %76, %80 : vector<16x128xi1>, vector<16x128xf32>
    %c0_75 = arith.constant 0 : index
    %c0_76 = arith.constant 0 : index
    %c0_77 = arith.constant 0 : index
    %c0_78 = arith.constant 0 : index
    %82 = vector.load %arg8[%c0_75, %c0_76, %c0_77, %c0_78] : memref<1x2x16x128xf32, #tpu.memory_space<vmem>>, vector<1x1x16x128xf32>
    %83 = vector.shape_cast %82 : vector<1x1x16x128xf32> to vector<16x128xf32>
    %84 = vector.shape_cast %81 : vector<16x128xf32> to vector<1x1x16x128xf32>
    tpu.vector_store %arg8[%c0_75, %c0_76, %c0_77, %c0_78], %84 {strides = array<i32>} : memref<1x2x16x128xf32, #tpu.memory_space<vmem>>, vector<1x1x16x128xf32>,
    return
  }
  func.func @transform_0(%arg0: i32) -> (i32, i32, i32) {
    %c0_i32 = arith.constant 0 : i32
    %c0_i32_0 = arith.constant 0 : i32
    %c0_i32_1 = arith.constant 0 : i32
    return %arg0, %c0_i32, %c0_i32_0 : i32, i32, i32
  }
  func.func @transform_1(%arg0: i32) -> (i32, i32, i32) {
    %c0_i32 = arith.constant 0 : i32
    %c0_i32_0 = arith.constant 0 : i32
    %c0_i32_1 = arith.constant 0 : i32
    %c0_i32_2 = arith.constant 0 : i32
    return %c0_i32, %c0_i32_0, %c0_i32_1 : i32, i32, i32
  }
  func.func @transform_2(%arg0: i32) -> (i32, i32) {
    %c0_i32 = arith.constant 0 : i32
    %c0_i32_0 = arith.constant 0 : i32
    %c0_i32_1 = arith.constant 0 : i32
    return %c0_i32, %c0_i32_0 : i32, i32
  }
  func.func @transform_3(%arg0: i32) -> (i32, i32, i32) {
    %c0_i32 = arith.constant 0 : i32
    %c0_i32_0 = arith.constant 0 : i32
    %c0_i32_1 = arith.constant 0 : i32
    %c0_i32_2 = arith.constant 0 : i32
    return %c0_i32, %c0_i32_0, %c0_i32_1 : i32, i32, i32
  }
  func.func @transform_4(%arg0: i32) -> (i32, i32) {
    %c0_i32 = arith.constant 0 : i32
    %c0_i32_0 = arith.constant 0 : i32
    %c0_i32_1 = arith.constant 0 : i32
    return %c0_i32, %c0_i32_0 : i32, i32
  }
  func.func @transform_5(%arg0: i32) -> (i32, i32, i32) {
    %c0_i32 = arith.constant 0 : i32
    %c0_i32_0 = arith.constant 0 : i32
    %c0_i32_1 = arith.constant 0 : i32
    %c0_i32_2 = arith.constant 0 : i32
    return %c0_i32, %c0_i32_0, %c0_i32_1 : i32, i32, i32
  }
  func.func @transform_6(%arg0: i32) -> (i32, i32) {
    %c0_i32 = arith.constant 0 : i32
    %c0_i32_0 = arith.constant 0 : i32
    %c0_i32_1 = arith.constant 0 : i32
    return %c0_i32, %c0_i32_0 : i32, i32
  }
  func.func @transform_7(%arg0: i32) -> (i32, i32, i32, i32) {
    %c0_i32 = arith.constant 0 : i32
    %c0_i32_0 = arith.constant 0 : i32
    %c0_i32_1 = arith.constant 0 : i32
    %c0_i32_2 = arith.constant 0 : i32
    return %arg0, %c0_i32, %c0_i32_0, %c0_i32_1 : i32, i32, i32, i32
  }
}

</mosaic_0001>

<bundles_post_ra>
// kernel: tile.23
= control target key start
LH: loop header
LB: loop body
LE: loop exit
PB: predicated region body
PF: predicated region fallthrough
CT: control target
= control target key end

     0   :  { %s28_s0 = inlined_call_operand.vmem [shape: f32[8], index: 0, kind: input, shape index: {}]   ;;  %s29_s1 = inlined_call_operand.vmem [shape: f32[16,8], index: 1, kind: output, shape index: {}]  }
   0x1   :  { %v4_v0 = vld [vmem:[%s28_s0] ss:$0 sm:$0xff] }
   0x2   :  { %5 = vst [vmem:[%s29_s1] sm:$0xff] %v4_v0  ;;  %8 = vst [vmem:[%s29_s1 + $0x8] sm:$0xff] %v4_v0 }

// kernel: tile.24
= control target key start
LH: loop header
LB: loop body
LE: loop exit
PB: predicated region body
PF: predicated region fallthrough
CT: control target
= control target key end

     0   :  { %s133_s10 = smov 120   ;;  %s134_s11 = smov 104   ;;  %vm3_vm0 = vcmask 64512   ;;  %vm9_vm1 = vcmask 1048512   ;;  %vm15_vm2 = vcmask 982912   ;;  %vm21_vm3 = vcmask 917312   ;;  %s209_s0 = inlined_call_operand.vmem [shape: f32[16,8], index: 0, kind: input, shape index: {}]   ;;  %s210_s1 = inlined_call_operand.vmem [shape: f32[1,128], index: 1, kind: output, shape index: {}]  }
   0x1   :  { %v103_v0 = vld [vmem:[%s209_s0 + $0xf] sm:$0x1]   ;;  %v105_v1 = vld [vmem:[%s209_s0 + $0xd] sm:$0x1]   ;;  %v104_v2 = vld [vmem:[%s209_s0 + $0xe] sm:$0x1]  }
   0x2   :  { %7 = vrot.lane.b32.xlu0 %v103_v0, %s133_s10  ;;  %19 = vrot.lane.b32.xlu1 %v105_v1, %s134_s11  ;;  %v106_v3 = vld [vmem:[%s209_s0 + $0xc] sm:$0x1]   ;;  %s135_s16 = smov 112   ;;  %s136_s17 = smov 96   ;;  %v107_v4 = vld [vmem:[%s209_s0 + $0xb] sm:$0x1]  }
   0x3   :  { %v108_v5 = vld [vmem:[%s209_s0 + $0xa] sm:$0x1]   ;;  %v2_v6 = vld [vmem:[%s209_s0] sm:$0x1]   ;;  %s137_s24 = smov 88   ;;  %s138_s25 = smov 80  }
   0x4   :  { %4 = vst.msk [vmem:[#allocation0] sm:$0x1] %vm3_vm0, %v2_v6   ;;  %v109_v7 = vld [vmem:[%s209_s0 + $0x9] sm:$0x1]   ;;  %v110_v8 = vld [vmem:[%s209_s0 + $0x8] sm:$0x1]  }
   0x5   :  { %s139_s30 = smov 72   ;;  %s140_s2 = smov 64   ;;  %v111_v9 = vld [vmem:[%s209_s0 + $0x7] sm:$0x1]   ;;  %v112_v10 = vld [vmem:[%s209_s0 + $0x6] sm:$0x1]  }
   0x6   :  { %13 = vrot.lane.b32.xlu0 %v104_v2, %s135_s16  ;;  %25 = vrot.lane.b32.xlu1 %v106_v3, %s136_s17  ;;  %s141_s7 = smov 56   ;;  %s142_s8 = smov 48   ;;  %v113_v11 = vld [vmem:[%s209_s0 + $0x5] sm:$0x1]   ;;  %v114_v12 = vld [vmem:[%s209_s0 + $0x4] sm:$0x1]  }
   0x7   :  { %s143_s13 = smov 40   ;;  %s144_s14 = smov 32   ;;  %v115_v13 = vld [vmem:[%s209_s0 + $0x3] sm:$0x1]   ;;  %v116_v14 = vld [vmem:[%s209_s0 + $0x2] sm:$0x1]  }
   0x8   :  { %s145_s19 = smov 24   ;;  %s146_s20 = smov 16   ;;  %v117_v15 = vld [vmem:[%s209_s0 + $0x1] sm:$0x1]   ;;  %vm27_vm4 = vcmask 851712   ;;  %vm33_vm5 = vcmask 786112  }
   0x9   :  { %s147_s0 = smov 8   ;;  %vm39_vm6 = vcmask 720512   ;;  %vm45_vm7 = vcmask 654912   ;;  %vm51_vm8 = vcmask 589312   ;;  %vm57_vm9 = vcmask 523712  }
   0xa   :  { %31 = vrot.lane.b32.xlu0 %v107_v4, %s137_s24  ;;  %37 = vrot.lane.b32.xlu1 %v108_v5, %s138_s25  ;;  %vm63_vm10 = vcmask 458112   ;;  %vm69_vm11 = vcmask 392512   ;;  %vm75_vm12 = vcmask 326912   ;;  %vm81_vm13 = vcmask 261312  }
   0xb   :  { %vm87_vm14 = vcmask 195712   ;;  %vm93_vm15 = vcmask 130112  }
   0xe   :  { %43 = vrot.lane.b32.xlu0 %v109_v7, %s139_s30  ;;  %49 = vrot.lane.b32.xlu1 %v110_v8, %s140_s2 }
  0x12   :  { %55 = vrot.lane.b32.xlu0 %v111_v9, %s141_s7  ;;  %61 = vrot.lane.b32.xlu1 %v112_v10, %s142_s8 }
  0x16   :  { %67 = vrot.lane.b32.xlu0 %v113_v11, %s143_s13  ;;  %73 = vrot.lane.b32.xlu1 %v114_v12, %s144_s14 }
  0x1a   :  { %79 = vrot.lane.b32.xlu0 %v115_v13, %s145_s19  ;;  %85 = vrot.lane.b32.xlu1 %v116_v14, %s146_s20 }
  0x1e   :  { %91 = vrot.lane.b32.xlu0 %v117_v15, %s147_s0 }
  0x74   :  { %v8_v16 = vpop.permute.xlu0 %7   ;;  %v20_v17 = vpop.permute.xlu1 %19  }
  0x75   :  { %10 = vst.msk [vmem:[#allocation0] sm:$0x1] %vm9_vm1, %v8_v16  }
  0x78   :  { %v14_v18 = vpop.permute.xlu0 %13   ;;  %v26_v19 = vpop.permute.xlu1 %25  }
  0x79   :  { %16 = vst.msk [vmem:[#allocation0] sm:$0x1] %vm15_vm2, %v14_v18  }
  0x7a   :  { %22 = vst.msk [vmem:[#allocation0] sm:$0x1] %vm21_vm3, %v20_v17  }
  0x7b   :  { %28 = vst.msk [vmem:[#allocation0] sm:$0x1] %vm27_vm4, %v26_v19  }
  0x7c   :  { %v32_v20 = vpop.permute.xlu0 %31   ;;  %v38_v21 = vpop.permute.xlu1 %37  }
  0x7d   :  { %34 = vst.msk [vmem:[#allocation0] sm:$0x1] %vm33_vm5, %v32_v20  }
  0x7e   :  { %40 = vst.msk [vmem:[#allocation0] sm:$0x1] %vm39_vm6, %v38_v21  }
  0x80   :  { %v44_v22 = vpop.permute.xlu0 %43   ;;  %v50_v23 = vpop.permute.xlu1 %49  }
  0x81   :  { %46 = vst.msk [vmem:[#allocation0] sm:$0x1] %vm45_vm7, %v44_v22  }
  0x82   :  { %52 = vst.msk [vmem:[#allocation0] sm:$0x1] %vm51_vm8, %v50_v23  }
  0x84   :  { %v56_v24 = vpop.permute.xlu0 %55   ;;  %v62_v25 = vpop.permute.xlu1 %61  }
  0x85   :  { %58 = vst.msk [vmem:[#allocation0] sm:$0x1] %vm57_vm9, %v56_v24  }
  0x86   :  { %64 = vst.msk [vmem:[#allocation0] sm:$0x1] %vm63_vm10, %v62_v25  }
  0x88   :  { %v68_v26 = vpop.permute.xlu0 %67   ;;  %v74_v27 = vpop.permute.xlu1 %73  }
  0x89   :  { %70 = vst.msk [vmem:[#allocation0] sm:$0x1] %vm69_vm11, %v68_v26  }
  0x8a   :  { %76 = vst.msk [vmem:[#allocation0] sm:$0x1] %vm75_vm12, %v74_v27  }
  0x8c   :  { %v80_v28 = vpop.permute.xlu0 %79   ;;  %v86_v29 = vpop.permute.xlu1 %85  }
  0x8d   :  { %82 = vst.msk [vmem:[#allocation0] sm:$0x1] %vm81_vm13, %v80_v28  }
  0x8e   :  { %88 = vst.msk [vmem:[#allocation0] sm:$0x1] %vm87_vm14, %v86_v29  }
  0x90   :  { %v92_v30 = vpop.permute.xlu0 %91  }
  0x91   :  { %94 = vst.msk [vmem:[#allocation0] sm:$0x1] %vm93_vm15, %v92_v30  }
  0x98   :  { %v99_v31 = vld [vmem:[#allocation0] sm:$0x1] }
  0x99   :  { %102 = vst [vmem:[%s210_s1] sm:$0x1] %v99_v31 }

// kernel: csp_block.1
= control target key start
LH: loop header
LB: loop body
LE: loop exit
PB: predicated region body
PF: predicated region fallthrough
CT: control target
= control target key end

     0   :  { %s2068_s24 = smov 0   ;;  %s2448_s0 = inlined_call_operand.vmem [shape: bf16[2,18,64], index: 0, kind: input, shape index: {}]   ;;  %s2449_s1 = inlined_call_operand.vmem [shape: bf16[3,64,128], index: 1, kind: input, shape index: {}]   ;;  %s2450_s2 = inlined_call_operand.vmem [shape: f32[1,128], index: 2, kind: input, shape index: {}]   ;;  %s2451_s3 = inlined_call_operand.vmem [shape: bf16[3,128,256], index: 3, kind: input, shape index: {}]   ;;  %s2452_s4 = inlined_call_operand.vmem [shape: f32[1,256], index: 4, kind: input, shape index: {}]   ;;  %s2453_s5 = inlined_call_operand.vmem [shape: bf16[3,128,128], index: 5, kind: input, shape index: {}]   ;;  %s2454_s6 = inlined_call_operand.vmem [shape: f32[1,128], index: 6, kind: input, shape index: {}]   ;;  %s2455_s7 = inlined_call_operand.vmem [shape: f32[2,2,16,128], index: 7, kind: output, shape index: {}]  }
   0x1 LB: > { %s1553_s25 = sadd.s32 4294967295, %s2023_s24   ;;  %p1557_p0 = scmp.ge.s32.totalorder %s2023_s24, 1  ;;  %s2023_s24 = sphi %s2068_s24, %s17_s24  }
   0x2   : > { %p237_p1 = scmp.lt.s32.totalorder %s2023_s24, 3 }
   0x4   : > { %p238_p2 = pnand %p1557_p0, %p237_p1 }
   0x5   : > { %p269_p3 = scmp.lt.s32.totalorder (!%p238_p2), %s1553_s25, 1 }
   0x6   : > { %241 = sbr.rel (%p238_p2) target bundleno = 776 (0x308), region = 48 }
   0xb   : > { %v1901_v0 = vld [vmem:[%s2449_s1 + $0x38] sm:$0xff]   ;;  %v2025_v1 = vmov 0.0   ;;  %v1903_v3 = vld [vmem:[%s2449_s1 + $0x30] sm:$0xff]   ;;  %vm2026_vm0 = vmmov 0   ;;  %s2463_s25 = smov (!%p269_p3, %s1553_s25), 1  ;;  %v1905_v5 = vld [vmem:[%s2449_s1 + $0x28] sm:$0xff]  }
   0xc   : > { %1793 = vmatprep.subr.bf16.mxu0 %v2025_v1  ;;  %1805 = vmatprep.subr.bf16.mxu1 %v2025_v1  ;;  %v1902_v2 = vld [vmem:[%s2449_s1 + $0x18] sm:$0xff]   ;;  %v1904_v4 = vld [vmem:[%s2449_s1 + $0x10] sm:$0xff]   ;;  %s1889_s13 = smul.u32 12, %s2463_s25  ;;  %v1906_v6 = vld [vmem:[%s2449_s1 + $0x8] sm:$0xff]   ;;  %vm325_vm1 = vsmask.f32 7424 }
   0xd   : > { %1794 = vmatpush3.bf16.msra.mxu0 %v1901_v0  ;;  %1801 = vmatprep.mubr.msk.bf16.mxu0 %vm2026_vm0, %v2025_v1  ;;  %v1907_v7 = vld [vmem:[%s2449_s1 + $0x20] sm:$0xff]   ;;  %v1911_v16 = vld [vmem:[%s2449_s1 + $0x58] sm:$0xff]   ;;  %vm362_vm2 = vcmask 523264   ;;  %v1912_v19 = vld [vmem:[%s2449_s1 + $0x50] sm:$0xff]   ;;  %vm483_vm3 = vcmask 1046528   ;;  %vm280_vm4 = vcmask 1040384  }
   0xe   : > { %1806 = vmatpush3.bf16.msra.mxu1 %v1902_v2  ;;  %1795 = vmatprep.subr.bf16.mxu0 %v2025_v1  ;;  %s273_s18 = scalar_lea.vmem %s2448_s0, %s1889_s13  ;;  %v1908_v10 = vld [vmem:[%s2449_s1] sm:$0xff]   ;;  %v1913_v20 = vld [vmem:[%s2449_s1 + $0x48] sm:$0xff]   ;;  %v1915_v25 = vld [vmem:[%s2451_s3 + $0x70] ss:$8 sps:$4 sm:$0xff]   ;;  %vm281_vm5 = vsmask.f32 256 }
   0xf   : > { %1807 = vmatprep.subr.bf16.mxu1 %v2025_v1  ;;  %1813 = vmatprep.mubr.msk.bf16.mxu1 %vm2026_vm0, %v2025_v1  ;;  %v1909_v8 = vld [vmem:[%s273_s18] sm:$0xff]   ;;  %v1910_v9 = vld [vmem:[%s273_s18 + $0x8] ss:$0 sps:$4 sm:$0x11]   ;;  %v1917_v26 = vld [vmem:[%s2451_s3 + $0x74] ss:$8 sps:$4 sm:$0xff]  }
  0x10   : > { %v327_v11 = vshrl.u32 %v1909_v8, 16  ;;  %v329_v12 = vshll.u32 %v1909_v8, 16  ;;  %v334_v13 = vshll.u32 %v1910_v9, 16  ;;  %v1914_v21 = vld [vmem:[%s2449_s1 + $0x40] sm:$0xff]   ;;  %v484_v22 = vrot.slane %v1909_v8, 1  ;;  %vm2148_vm7 = vmand %vm280_vm4, %vm281_vm5  ;;  %s1746_s16 = sshll.u32 %s2463_s25, 5 }
  0x11   : > { %1796 = vmatpush3.bf16.msra.mxu0 %v1903_v3  ;;  %v485_v23 = vrot.slane %v1910_v9, 1  ;;  %v283_v27 = vld [vmem:[#allocation2] sm:$0x1]  ;;  %vm286_vm6 = vsmask.f32 7938  ;;  %v2027_v61 = vmov 0   ;;  %s2395_s19 = scalar_lea.vmem %s2455_s7, %s1746_s16 }
  0x12   : > { %1808 = vmatpush3.bf16.msra.mxu1 %v1904_v4  ;;  %1797 = vmatprep.subr.bf16.mxu0 %v2025_v1  ;;  %v331_v14 = vrot.slane %v329_v12, 1  ;;  %v336_v15 = vrot.slane %v334_v13, 1  ;;  %v288_v29 = vld [vmem:[#allocation2 + $0x8] sm:$0x1]  ;;  %v294_v30 = vld [vmem:[#allocation3 + $0x8] sm:$0x1]  ;;  %vm287_vm8 = vmand %vm280_vm4, %vm286_vm6 }
  0x13   : > { %1809 = vmatprep.subr.bf16.mxu1 %v2025_v1  ;;  %v486_v24 = vsel %vm483_vm3, %v484_v22, %v485_v23  ;;  %v284_v31 = vsel %vm2148_vm7, 0, %v283_v27  ;;  %v289_v32 = vsel %vm287_vm8, 0, %v288_v29  ;;  %v295_v33 = vsel %vm287_vm8, 0, %v294_v30  ;;  %v1920_v34 = vld [vmem:[%s2451_s3 + $0x64] ss:$8 sps:$4 sm:$0xff]  }
  0x14   : > { %v332_v17 = vor.u32 %v331_v14, %v327_v11  ;;  %285 = vst [vmem:[#allocation2] sm:$0x1] %v284_v31  ;;  %290 = vst [vmem:[#allocation2 + $0x8] sm:$0x1] %v289_v32  ;;  %v1918_v35 = vld [vmem:[%s2451_s3 + $0x60] ss:$8 sps:$4 sm:$0xff]  }
  0x15   : > { %1798 = vmatpush3.bf16.msra.mxu0 %v1905_v5  ;;  %296 = vst [vmem:[#allocation3 + $0x8] sm:$0x1] %v295_v33  ;;  %v1923_v36 = vld [vmem:[%s2451_s3 + $0xf4] ss:$8 sps:$4 sm:$0xff]   ;;  %v1921_v37 = vld [vmem:[%s2451_s3 + $0xf0] ss:$8 sps:$4 sm:$0xff]  }
  0x16   : > { %1810 = vmatpush3.bf16.msra.mxu1 %v1906_v6  ;;  %1799 = vmatprep.subr.bf16.mxu0 %v2025_v1  ;;  %v337_v18 = vsel %vm325_vm1, %v332_v17, %v336_v15  ;;  %v1926_v38 = vld [vmem:[%s2451_s3 + $0x54] ss:$8 sps:$4 sm:$0xff]   ;;  %v1924_v39 = vld [vmem:[%s2451_s3 + $0x50] ss:$8 sps:$4 sm:$0xff]   ;;  %v1929_v40 = vld [vmem:[%s2451_s3 + $0xe4] ss:$8 sps:$4 sm:$0xff]  }
  0x17   : > { %1811 = vmatprep.subr.bf16.mxu1 %v2025_v1  ;;  %v1927_v41 = vld [vmem:[%s2451_s3 + $0xe0] ss:$8 sps:$4 sm:$0xff]   ;;  %v1932_v42 = vld [vmem:[%s2451_s3 + $0x44] ss:$8 sps:$4 sm:$0xff]   ;;  %v1935_v44 = vld [vmem:[%s2451_s3 + $0xd4] ss:$8 sps:$4 sm:$0xff]  }
  0x18   : > { %v1930_v43 = vld [vmem:[%s2451_s3 + $0x40] ss:$8 sps:$4 sm:$0xff]   ;;  %v1933_v45 = vld [vmem:[%s2451_s3 + $0xd0] ss:$8 sps:$4 sm:$0xff]   ;;  %v1938_v46 = vld [vmem:[%s2451_s3 + $0x34] ss:$8 sps:$4 sm:$0xff]  }
  0x19   : > { %1800 = vmatpush3.bf16.msra.mxu0 %v1907_v7  ;;  %v1936_v47 = vld [vmem:[%s2451_s3 + $0x30] ss:$8 sps:$4 sm:$0xff]   ;;  %v1941_v48 = vld [vmem:[%s2451_s3 + $0xc4] ss:$8 sps:$4 sm:$0xff]   ;;  %v1939_v49 = vld [vmem:[%s2451_s3 + $0xc0] ss:$8 sps:$4 sm:$0xff]  }
  0x1a   : > { %1812 = vmatpush3.bf16.msra.mxu1 %v1908_v10  ;;  %1817 = vmatprep.subr.bf16.mxu0 %v2025_v1  ;;  %v1944_v50 = vld [vmem:[%s2451_s3 + $0x24] ss:$8 sps:$4 sm:$0xff]   ;;  %v1942_v51 = vld [vmem:[%s2451_s3 + $0x20] ss:$8 sps:$4 sm:$0xff]   ;;  %v1947_v52 = vld [vmem:[%s2451_s3 + $0xb4] ss:$8 sps:$4 sm:$0xff]  }
  0x1b   : > { %746 = vmatprep.subr.bf16.mxu1 %v1923_v36  ;;  %v1945_v53 = vld [vmem:[%s2451_s3 + $0xb0] ss:$8 sps:$4 sm:$0xff]   ;;  %v1950_v55 = vld [vmem:[%s2451_s3 + $0x14] ss:$8 sps:$4 sm:$0xff]   ;;  %v1951_v56 = vld [vmem:[%s2451_s3 + $0xa0] ss:$8 sps:$4 sm:$0xff]  }
  0x1c   : > { %1802 = vmatmul.mubr.msk.bf16.vlgmr.msra.gmra.mxu0 %vm362_vm2, %v337_v18  ;;  %v1948_v54 = vld [vmem:[%s2451_s3 + $0x10] ss:$8 sps:$4 sm:$0xff]   ;;  %v1953_v57 = vld [vmem:[%s2451_s3 + $0xa4] ss:$8 sps:$4 sm:$0xff]   ;;  %v1959_v59 = vld [vmem:[%s2451_s3 + $0x94] ss:$8 sps:$4 sm:$0xff]  }
  0x1d   : > { %1814 = vmatmul.mubr.msk.bf16.vlgmr.msra.gmra.mxu1 %vm362_vm2, %v1909_v8  ;;  %1818 = vmatpush3.bf16.msra.mxu0 %v1911_v16  ;;  %v1956_v58 = vld [vmem:[%s2451_s3 + $0x4] ss:$8 sps:$4 sm:$0xff]   ;;  %v1954_v60 = vld [vmem:[%s2451_s3] ss:$8 sps:$4 sm:$0xff]   ;;  %v1957_v62 = vld [vmem:[%s2451_s3 + $0x90] ss:$8 sps:$4 sm:$0xff]  }
  0x1e   : > { %1825 = vmatprep.mubr.msk.bf16.mxu0 %vm2026_vm0, %v2025_v1  ;;  %1819 = vmatprep.subr.bf16.mxu0 %v2025_v1  ;;  %v1961_v63 = vld [vmem:[%s2451_s3 + $0x80] ss:$8 sps:$4 sm:$0xff]   ;;  %v1963_v0 = vld [vmem:[%s2451_s3 + $0x84] ss:$8 sps:$4 sm:$0xff]   ;;  %v1966_v2 = vld [vmem:[%s2451_s3 + $0x174] ss:$8 sps:$4 sm:$0xff]  }
  0x1f   : > { %747 = vmatpush1.bf16.msra.mxu1 %v1921_v37  ;;  %778 = vmatprep.mubr.bf16.mxu1 %v2027_v61  ;;  %v1594_v13 = vld [vmem:[%s2450_s2] ss:$0 sm:$0xff]  ;;  %vm600_vm11 = vcmask 1043456   ;;  %vm578_vm13 = vsmask.f32 4368 }
  0x20   : > { %748 = vmatprep.subr.bf16.mxu1 %v1929_v40  ;;  %vm2255_vm12 = vmand %vm600_vm11, %vm286_vm6  ;;  %v602_v33 = vld [vmem:[#allocation2] sm:$0xf]  ;;  %v606_v40 = vld [vmem:[#allocation2 + $0x8] sm:$0x1] }
  0x21   : > { %1820 = vmatpush3.bf16.msra.mxu0 %v1912_v19  ;;  %vm2262_vm14 = vmor %vm281_vm5, %vm578_vm13 }
  0x22   : > { %1821 = vmatprep.subr.bf16.mxu0 %v2025_v1 }
  0x23   : > { %749 = vmatpush1.bf16.msra.mxu1 %v1927_v41 }
  0x24   : > { %750 = vmatprep.subr.bf16.mxu1 %v1935_v44 }
  0x25   : > { %1822 = vmatpush3.bf16.msra.mxu0 %v1913_v20 }
  0x26   : > { %1823 = vmatprep.subr.bf16.mxu0 %v2025_v1 }
  0x27   : > { %751 = vmatpush1.bf16.msra.mxu1 %v1933_v45 }
  0x28   : > { %752 = vmatprep.subr.bf16.mxu1 %v1941_v48 }
  0x29   : > { %1824 = vmatpush3.bf16.msra.mxu0 %v1914_v21 }
  0x2a   : > { %870 = vmatprep.subr.bf16.mxu0 %v1917_v26 }
  0x2b   : > { %753 = vmatpush1.bf16.msra.mxu1 %v1939_v49 }
  0x2c   : > { %1826 = vmatmul.mubr.msk.bf16.vlgmr.msra.gmra.mxu0 %vm362_vm2, %v486_v24  ;;  %754 = vmatprep.subr.bf16.mxu1 %v1947_v52 }
  0x2d   : > { %871 = vmatpush1.bf16.msra.mxu0 %v1915_v25  ;;  %902 = vmatprep.mubr.bf16.mxu0 %v2027_v61 }
  0x2e   : > { %872 = vmatprep.subr.bf16.mxu0 %v1920_v34 }
  0x2f   : > { %755 = vmatpush1.bf16.msra.mxu1 %v1945_v53 }
  0x30   : > { %756 = vmatprep.subr.bf16.mxu1 %v1953_v57  ;;  %v1970_v57 = vld [vmem:[%s2451_s3 + $0x164] ss:$8 sps:$4 sm:$0xff]  }
  0x31   : > { %873 = vmatpush1.bf16.msra.mxu0 %v1918_v35 }
  0x32   : > { %874 = vmatprep.subr.bf16.mxu0 %v1926_v38 }
  0x33   : > { %757 = vmatpush1.bf16.msra.mxu1 %v1951_v56 }
  0x34   : > { %758 = vmatprep.subr.bf16.mxu1 %v1959_v59  ;;  %v1968_v59 = vld [vmem:[%s2451_s3 + $0x160] ss:$8 sps:$4 sm:$0xff]  }
  0x35   : > { %875 = vmatpush1.bf16.msra.mxu0 %v1924_v39  ;;  %v2008_v39 = vld [vmem:[%s2453_s5 + $0xb8] sm:$0xff]  }
  0x36   : > { %876 = vmatprep.subr.bf16.mxu0 %v1932_v42 }
  0x37   : > { %759 = vmatpush1.bf16.msra.mxu1 %v1957_v62  ;;  %v1971_v62 = vld [vmem:[%s2451_s3 + $0x150] ss:$8 sps:$4 sm:$0xff]  }
  0x38   : > { %760 = vmatprep.subr.bf16.mxu1 %v1963_v0  ;;  %v1979_v0 = vld [vmem:[%s2451_s3 + $0x134] ss:$8 sps:$4 sm:$0xff]  }
  0x39   : > { %877 = vmatpush1.bf16.msra.mxu0 %v1930_v43 }
  0x3a   : > { %878 = vmatprep.subr.bf16.mxu0 %v1938_v46 }
  0x3b   : > { %761 = vmatpush1.bf16.msra.mxu1 %v1961_v63  ;;  %v1976_v63 = vld [vmem:[%s2451_s3 + $0x144] ss:$8 sps:$4 sm:$0xff]  }
  0x3c   : > { %1018 = vmatprep.subr.bf16.mxu1 %v1966_v2  ;;  %v1977_v2 = vld [vmem:[%s2451_s3 + $0x130] ss:$8 sps:$4 sm:$0xff]  }
  0x3d   : > { %879 = vmatpush1.bf16.msra.mxu0 %v1936_v47 }
  0x3e   : > { %880 = vmatprep.subr.bf16.mxu0 %v1944_v50 }
  0x41   : > { %881 = vmatpush1.bf16.msra.mxu0 %v1942_v51 }
  0x42   : > { %882 = vmatprep.subr.bf16.mxu0 %v1950_v55 }
  0x45   : > { %883 = vmatpush1.bf16.msra.mxu0 %v1948_v54  ;;  %v1964_v54 = vld [vmem:[%s2451_s3 + $0x170] ss:$8 sps:$4 sm:$0xff]  }
  0x46   : > { %884 = vmatprep.subr.bf16.mxu0 %v1956_v58 }
  0x49   : > { %885 = vmatpush1.bf16.msra.mxu0 %v1954_v60  ;;  %v1973_v60 = vld [vmem:[%s2451_s3 + $0x154] ss:$8 sps:$4 sm:$0xff]  }
  0x4a   : > { %1829 = vmatprep.subr.bf16.mxu0 %v2025_v1 }
  0xdc   : > { %v400_v4 = vpop.f32.mrf.mxu0 }
  0xdd   : > { %v467_v3 = vpop.f32.mrf.mxu1 }
  0xde   : > { %v1803_v6 = vpop.f32.mrf.mxu0  ;;  %v468_v11 = vadd.f32 %v467_v3, %v400_v4  ;;  %v1982_v3 = vld [vmem:[%s2451_s3 + $0x124] ss:$8 sps:$4 sm:$0xff]   ;;  %v1980_v4 = vld [vmem:[%s2451_s3 + $0x120] ss:$8 sps:$4 sm:$0xff]  }
  0xdf   : > { %v1815_v5 = vpop.f32.mrf.mxu1  ;;  %v1983_v6 = vld [vmem:[%s2451_s3 + $0x110] ss:$8 sps:$4 sm:$0xff]  }
  0xe0   : > { %v403_v8 = vpop.f32.mrf.mxu0  ;;  %v1985_v5 = vld [vmem:[%s2451_s3 + $0x114] ss:$8 sps:$4 sm:$0xff]  }
  0xe1   : > { %v470_v7 = vpop.f32.mrf.mxu1 }
  0xe2   : > { %v1804_v10 = vpop.f32.mrf.mxu0  ;;  %v471_v16 = vadd.f32 %v470_v7, %v403_v8  ;;  %v1988_v7 = vld [vmem:[%s2451_s3 + $0x104] ss:$8 sps:$4 sm:$0xff]  }
  0xe3   : > { %v1816_v9 = vpop.f32.mrf.mxu1  ;;  %v1986_v10 = vld [vmem:[%s2451_s3 + $0x100] ss:$8 sps:$4 sm:$0xff]  }
  0xec   : > { %v548_v12 = vpop.f32.mrf.mxu0 }
  0xed   : > { %v555_v14 = vadd.f32 %v548_v12, %v468_v11 }
  0xee   : > { %v1827_v15 = vpop.f32.mrf.mxu0 }
  0xef   : > { %v564_v17 = vadd.f32 %v1594_v13, %v555_v14  ;;  %v1990_v14 = vld [vmem:[%s2453_s5 + $0x38] sm:$0xff]   ;;  %v1991_v15 = vld [vmem:[%s2453_s5 + $0x30] sm:$0xff]  }
  0xf0   : > { %v551_v18 = vpop.f32.mrf.mxu0 }
  0xf1   : > { %vm566_vm9 = vcmp.ge.f32.partialorder %v564_v17, 0.0  ;;  %v568_v19 = vmul.f32 0.1, %v564_v17  ;;  %v556_v20 = vadd.f32 %v551_v18, %v471_v16  ;;  %v1992_v16 = vld [vmem:[%s2453_s5 + $0x78] sm:$0xff]  }
  0xf2   : > { %v1828_v21 = vpop.f32.mrf.mxu0 }
  0xf3   : > { %v570_v22 = vsel %vm566_vm9, %v564_v17, %v568_v19  ;;  %v565_v23 = vadd.f32 %v1594_v13, %v556_v20  ;;  %v291_v17 = vld [vmem:[#allocation3] sm:$0x1]  ;;  %v1994_v20 = vld [vmem:[%s2453_s5 + $0x70] sm:$0xff]   ;;  %v1995_v21 = vld [vmem:[%s2453_s5 + $0x20] sm:$0xff]  }
  0xf4   : > { %v1747_v24 = vpack.c.bf16 %v570_v22, %v570_v22  ;;  %v292_v18 = vsel %vm2148_vm7, 0, %v291_v17  ;;  %v1993_v19 = vld [vmem:[%s2453_s5 + $0x28] sm:$0xff]  }
  0xf5   : > { %vm567_vm10 = vcmp.ge.f32.partialorder %v565_v23, 0.0  ;;  %v569_v25 = vmul.f32 0.1, %v565_v23  ;;  %293 = vst [vmem:[#allocation3] sm:$0x1] %v292_v18  ;;  %v1996_v22 = vld [vmem:[%s2453_s5 + $0x68] sm:$0xff]  }
  0xf6   : > { %v581_v26 = vshrl.u32 %v1747_v24, 16  ;;  %v584_v30 = vshll.u32 %v1747_v24, 16  ;;  %v1998_v24 = vld [vmem:[%s2453_s5 + $0x60] sm:$0xff]  }
  0xf7   : > { %v571_v27 = vsel %vm567_vm10, %v565_v23, %v569_v25  ;;  %v1997_v23 = vld [vmem:[%s2453_s5 + $0x18] sm:$0xff]   ;;  %v1999_v25 = vld [vmem:[%s2453_s5 + $0x10] sm:$0xff]  }
  0xf8   : > { %v583_v29 = vrot.slane %v581_v26, 7  ;;  %v1748_v31 = vpack.c.bf16 %v571_v27, %v571_v27  ;;  %v2000_v26 = vld [vmem:[%s2453_s5 + $0x58] sm:$0xff]   ;;  %v2001_v27 = vld [vmem:[%s2453_s5 + $0x8] sm:$0xff]  }
  0xfa   : > { %v586_v34 = vor.u32 %v584_v30, %v583_v29  ;;  %v589_v35 = vshrl.u32 %v1748_v31, 16  ;;  %v592_v38 = vshll.u32 %v1748_v31, 16  ;;  %v587_v41 = vrot.slane %v583_v29, 4  ;;  %v2002_v29 = vld [vmem:[%s2453_s5 + $0x50] sm:$0xff]   ;;  %v2003_v30 = vld [vmem:[%s2453_s5] sm:$0xff]   ;;  %v2004_v31 = vld [vmem:[%s2453_s5 + $0x48] sm:$0xff]  }
  0xfc   : > { %v603_v36 = vsel %vm2255_vm12, %v586_v34, %v602_v33  ;;  %v591_v37 = vrot.slane %v589_v35, 7  ;;  %v2006_v33 = vld [vmem:[%s2453_s5 + $0x40] sm:$0xff]   ;;  %v1067_v35 = vlaneseq }
  0xfd   : > { %604 = vst [vmem:[#allocation2] sm:$0xf] %v603_v36 }
  0xfe   : > { %v594_v42 = vor.u32 %v592_v38, %v591_v37  ;;  %v596_v43 = vrot.slane %v591_v37, 4  ;;  %v1068_v37 = vshrl.u32 %v1067_v35, 7 }
 0x100   : > { %v595_v44 = vsel %vm2262_vm14, %v587_v41, %v594_v42  ;;  %v607_v45 = vsel %vm2148_vm7, %v596_v43, %v606_v40  ;;  %v1069_v41 = vsub.s32 0, %v1068_v37  ;;  %v1065_v42 = vld [vmem:[%s2452_s4] sm:$0x3] }
 0x101   : > { %605 = vst [vmem:[#allocation2 + $0x4] sm:$0xf] %v595_v44  ;;  %608 = vst [vmem:[#allocation2 + $0x8] sm:$0x1] %v607_v45  ;;  %v1073_v44 = vsub.s32 1, %v1068_v37 }
 0x104   : > { %v609_v46 = vld [vmem:[#allocation2] sm:$0xf] }
 0x105   : > { %v913_v8 = vld [vmem:[#allocation2] sm:$0xe] }
 0x108   : > { %v610_v47 = vld [vmem:[#allocation2 + $0x4] sm:$0xf]  ;;  %v1967_v49 = vld [vmem:[#allocation2 + $0x8] ss:$0 sps:$4 sm:$0x11]  }
 0x109   : > { %v1613_v48 = vcombine.low %v609_v46, %v610_v47  ;;  %v661_v51 = vshll.u32 %v1967_v49, 16  ;;  %v1663_v9 = vcombine.low %v913_v8, %v610_v47  ;;  %v935_v12 = vrot.slane %v1967_v49, 1 }
 0x10a   : > { %v1070_v47 = vrot.slane %v1065_v42, %v1069_v41  ;;  %v2010_v41 = vld [vmem:[%s2453_s5 + $0xa8] sm:$0xff]  }
 0x10b   : > { %903 = vmatmul.mubr.bf16.vlgmr.msra.gmra.mxu0 %v1613_v48  ;;  %v656_v50 = vshll.u32 %v1613_v48, 16  ;;  %v654_v52 = vshrl.u32 %v1613_v48, 16  ;;  %v663_v56 = vrot.slane %v661_v51, 1  ;;  %v934_v11 = vrot.slane %v1663_v9, 1 }
 0x10c   : > { %1845 = vmatprep.mubr.msk.bf16.mxu0 %vm2026_vm0, %v2025_v1  ;;  %1830 = vmatpush3.bf16.msra.mxu0 %v1992_v16 }
 0x10d   : > { %v658_v53 = vrot.slane %v656_v50, 1  ;;  %v936_v13 = vsel %vm483_vm3, %v934_v11, %v935_v12  ;;  %1831 = vmatprep.subr.bf16.mxu0 %v2025_v1 }
 0x10f   : > { %v659_v55 = vor.u32 %v658_v53, %v654_v52  ;;  %v1074_v52 = vrot.slane %v1065_v42, %v1073_v44  ;;  %v2011_v42 = vld [vmem:[%s2453_s5 + $0xa0] sm:$0xff]   ;;  %v2013_v44 = vld [vmem:[%s2453_s5 + $0x90] sm:$0xff]  }
 0x110   : > { %1832 = vmatpush3.bf16.msra.mxu0 %v1994_v20 }
 0x111   : > { %v664_v58 = vsel %vm325_vm1, %v659_v55, %v663_v56  ;;  %1833 = vmatprep.subr.bf16.mxu0 %v2025_v1 }
 0x112   : > { %779 = vmatmul.mubr.bf16.vlgmr.msra.gmra.mxu1 %v664_v58 }
 0x113   : > { %1019 = vmatpush1.bf16.msra.mxu1 %v1964_v54  ;;  %1050 = vmatprep.mubr.bf16.mxu1 %v2027_v61  ;;  %v1974_v61 = vld [vmem:[%s2451_s3 + $0x140] ss:$8 sps:$4 sm:$0xff]  }
 0x114   : > { %1020 = vmatprep.subr.bf16.mxu1 %v1970_v57  ;;  %1834 = vmatpush3.bf16.msra.mxu0 %v1996_v22  ;;  %v1126_v22 = vld [vmem:[#allocation3 + $0x8] sm:$0x1] }
 0x115   : > { %1835 = vmatprep.subr.bf16.mxu0 %v2025_v1 }
 0x117   : > { %1021 = vmatpush1.bf16.msra.mxu1 %v1968_v59 }
 0x118   : > { %1022 = vmatprep.subr.bf16.mxu1 %v1973_v60  ;;  %1836 = vmatpush3.bf16.msra.mxu0 %v1998_v24 }
 0x119   : > { %1837 = vmatprep.subr.bf16.mxu0 %v2025_v1 }
 0x11b   : > { %1023 = vmatpush1.bf16.msra.mxu1 %v1971_v62 }
 0x11c   : > { %1024 = vmatprep.subr.bf16.mxu1 %v1976_v63  ;;  %1838 = vmatpush3.bf16.msra.mxu0 %v2000_v26 }
 0x11d   : > { %1839 = vmatprep.subr.bf16.mxu0 %v2025_v1 }
 0x11f   : > { %1025 = vmatpush1.bf16.msra.mxu1 %v1974_v61 }
 0x120   : > { %1026 = vmatprep.subr.bf16.mxu1 %v1979_v0  ;;  %1840 = vmatpush3.bf16.msra.mxu0 %v2002_v29 }
 0x121   : > { %1841 = vmatprep.subr.bf16.mxu0 %v2025_v1 }
 0x123   : > { %1027 = vmatpush1.bf16.msra.mxu1 %v1977_v2 }
 0x124   : > { %1028 = vmatprep.subr.bf16.mxu1 %v1982_v3  ;;  %1842 = vmatpush3.bf16.msra.mxu0 %v2004_v31 }
 0x125   : > { %1843 = vmatprep.subr.bf16.mxu0 %v2025_v1 }
 0x127   : > { %1029 = vmatpush1.bf16.msra.mxu1 %v1980_v4 }
 0x128   : > { %1030 = vmatprep.subr.bf16.mxu1 %v1985_v5  ;;  %1844 = vmatpush3.bf16.msra.mxu0 %v2006_v33 }
 0x129   : > { %1869 = vmatprep.subr.bf16.mxu0 %v2025_v1 }
 0x12b   : > { %1031 = vmatpush1.bf16.msra.mxu1 %v1983_v6 }
 0x12c   : > { %1032 = vmatprep.subr.bf16.mxu1 %v1988_v7 }
 0x12f   : > { %1033 = vmatpush1.bf16.msra.mxu1 %v1986_v10 }
 0x130   : > { %1849 = vmatprep.subr.bf16.mxu1 %v2025_v1 }
 0x132   : > { %1051 = vmatmul.mubr.bf16.vlgmr.msra.gmra.mxu1 %v936_v13 }
 0x133   : > { %1865 = vmatprep.mubr.msk.bf16.mxu1 %vm2026_vm0, %v2025_v1  ;;  %1850 = vmatpush3.bf16.msra.mxu1 %v1990_v14 }
 0x134   : > { %1851 = vmatprep.subr.bf16.mxu1 %v2025_v1 }
 0x137   : > { %1852 = vmatpush3.bf16.msra.mxu1 %v1991_v15  ;;  %v1122_v15 = vld [vmem:[#allocation3] sm:$0xf] }
 0x138   : > { %1853 = vmatprep.subr.bf16.mxu1 %v2025_v1 }
 0x13b   : > { %1854 = vmatpush3.bf16.msra.mxu1 %v1993_v19 }
 0x13c   : > { %1855 = vmatprep.subr.bf16.mxu1 %v2025_v1 }
 0x13f   : > { %1856 = vmatpush3.bf16.msra.mxu1 %v1995_v21 }
 0x140   : > { %1857 = vmatprep.subr.bf16.mxu1 %v2025_v1 }
 0x143   : > { %1858 = vmatpush3.bf16.msra.mxu1 %v1997_v23 }
 0x144   : > { %1859 = vmatprep.subr.bf16.mxu1 %v2025_v1 }
 0x147   : > { %1860 = vmatpush3.bf16.msra.mxu1 %v1999_v25 }
 0x148   : > { %1861 = vmatprep.subr.bf16.mxu1 %v2025_v1 }
 0x14b   : > { %1862 = vmatpush3.bf16.msra.mxu1 %v2001_v27 }
 0x14c   : > { %1863 = vmatprep.subr.bf16.mxu1 %v2025_v1 }
 0x14f   : > { %1864 = vmatpush3.bf16.msra.mxu1 %v2003_v30 }
 0x1cb   : > { %v904_v38 = vpop.f32.mrf.mxu0 }
 0x1cd   : > { %v906_v43 = vpop.f32.mrf.mxu0 }
 0x1cf   : > { %v908_v49 = vpop.f32.mrf.mxu0 }
 0x1d1   : > { %v910_v58 = vpop.f32.mrf.mxu0 }
 0x1d2   : > { %v780_v34 = vpop.f32.mrf.mxu1 }
 0x1d3   : > { %v905_v46 = vadd.f32 %v904_v38, %v780_v34 }
 0x1d4   : > { %v782_v36 = vpop.f32.mrf.mxu1 }
 0x1d5   : > { %v907_v50 = vadd.f32 %v906_v43, %v782_v36  ;;  %v2012_v43 = vld [vmem:[%s2453_s5 + $0x98] sm:$0xff]  }
 0x1d6   : > { %v784_v40 = vpop.f32.mrf.mxu1 }
 0x1d7   : > { %v909_v54 = vadd.f32 %v908_v49, %v784_v40  ;;  %v2009_v40 = vld [vmem:[%s2453_s5 + $0xb0] sm:$0xff]  }
 0x1d8   : > { %v786_v45 = vpop.f32.mrf.mxu1 }
 0x1d9   : > { %v911_v63 = vadd.f32 %v910_v58, %v786_v45  ;;  %v2014_v45 = vld [vmem:[%s2453_s5 + $0x88] sm:$0xff]  }
 0x1f2   : > { %v1052_v48 = vpop.f32.mrf.mxu1 }
 0x1f3   : > { %v1061_v51 = vadd.f32 %v1052_v48, %v905_v46  ;;  %v2015_v48 = vld [vmem:[%s2453_s5 + $0x80] sm:$0xff]  }
 0x1f4   : > { %v1054_v53 = vpop.f32.mrf.mxu1 }
 0x1f5   : > { %v1077_v55 = vadd.f32 %v1070_v47, %v1061_v51  ;;  %v1062_v56 = vadd.f32 %v1054_v53, %v907_v50 }
 0x1f6   : > { %v1056_v57 = vpop.f32.mrf.mxu1 }
 0x1f7   : > { %vm1081_vm15 = vcmp.ge.f32.partialorder %v1077_v55, 0.0  ;;  %v1085_v59 = vmul.f32 0.1, %v1077_v55  ;;  %v1078_v60 = vadd.f32 %v1074_v52, %v1062_v56  ;;  %v1063_v62 = vadd.f32 %v1056_v57, %v909_v54 }
 0x1f8   : > { %v1058_v61 = vpop.f32.mrf.mxu1 }
 0x1f9   : > { %v1089_v0 = vsel %vm1081_vm15, %v1077_v55, %v1085_v59  ;;  %vm1082_vm2 = vcmp.ge.f32.partialorder %v1078_v60, 0.0  ;;  %v1086_v2 = vmul.f32 0.1, %v1078_v60  ;;  %v1079_v3 = vadd.f32 %v1070_v47, %v1063_v62 }
 0x1fa   : > { %1680 = vst [vmem:[%s2395_s19 + $0x10] sm:$0xff] %v1089_v0  ;;  %v1064_v4 = vadd.f32 %v1058_v61, %v911_v63 }
 0x1fb   : > { %v1090_v5 = vsel %vm1082_vm2, %v1078_v60, %v1086_v2  ;;  %vm1083_vm4 = vcmp.ge.f32.partialorder %v1079_v3, 0.0  ;;  %v1087_v6 = vmul.f32 0.1, %v1079_v3 }
 0x1fc   : > { %v1749_v7 = vpack.c.bf16 %v1090_v5, %v1090_v5  ;;  %v1080_v8 = vadd.f32 %v1074_v52, %v1064_v4 }
 0x1fd   : > { %v1091_v9 = vsel %vm1083_vm4, %v1079_v3, %v1087_v6 }
 0x1fe   : > { %v1103_v10 = vshrl.u32 %v1749_v7, 16  ;;  %1681 = vst [vmem:[%s2395_s19 + $0x18] sm:$0xff] %v1091_v9  ;;  %vm1084_vm5 = vcmp.ge.f32.partialorder %v1080_v8, 0.0  ;;  %v1088_v11 = vmul.f32 0.1, %v1080_v8  ;;  %v1106_v13 = vshll.u32 %v1749_v7, 16 }
 0x200   : > { %v1105_v12 = vrot.slane %v1103_v10, 7  ;;  %v1092_v14 = vsel %vm1084_vm5, %v1080_v8, %v1088_v11 }
 0x201   : > { %v1750_v16 = vpack.c.bf16 %v1092_v14, %v1092_v14 }
 0x202   : > { %v1108_v17 = vor.u32 %v1106_v13, %v1105_v12  ;;  %v1109_v23 = vrot.slane %v1105_v12, 4 }
 0x203   : > { %v1111_v18 = vshrl.u32 %v1750_v16, 16  ;;  %v1114_v21 = vshll.u32 %v1750_v16, 16 }
 0x204   : > { %v1123_v19 = vsel %vm2255_vm12, %v1108_v17, %v1122_v15 }
 0x205   : > { %1124 = vst [vmem:[#allocation3] sm:$0xf] %v1123_v19  ;;  %v1113_v20 = vrot.slane %v1111_v18, 7 }
 0x207   : > { %v1116_v24 = vor.u32 %v1114_v21, %v1113_v20  ;;  %v1118_v25 = vrot.slane %v1113_v20, 4 }
 0x209   : > { %v1117_v26 = vsel %vm2262_vm14, %v1109_v23, %v1116_v24  ;;  %v1127_v27 = vsel %vm2148_vm7, %v1118_v25, %v1126_v22 }
 0x20a   : > { %1125 = vst [vmem:[#allocation3 + $0x4] sm:$0xf] %v1117_v26  ;;  %1128 = vst [vmem:[#allocation3 + $0x8] sm:$0x1] %v1127_v27 }
 0x20c   : > { %v1129_v29 = vld [vmem:[#allocation3] sm:$0xf] }
 0x20d   : > { %v1365_v46 = vld [vmem:[#allocation3] sm:$0xe] }
 0x211   : > { %v1130_v30 = vld [vmem:[#allocation3 + $0x4] sm:$0xf]  ;;  %v2007_v32 = vld [vmem:[#allocation3 + $0x8] ss:$0 sps:$4 sm:$0x11]  }
 0x212   : > { %v1700_v31 = vcombine.low %v1129_v29, %v1130_v30  ;;  %v1181_v34 = vshll.u32 %v2007_v32, 16  ;;  %v1734_v47 = vcombine.low %v1365_v46, %v1130_v30  ;;  %v1387_v50 = vrot.slane %v2007_v32, 1 }
 0x214   : > { %1866 = vmatmul.mubr.bf16.vlgmr.msra.gmra.mxu1 %v1700_v31  ;;  %v1176_v33 = vshll.u32 %v1700_v31, 16  ;;  %v1174_v35 = vshrl.u32 %v1700_v31, 16  ;;  %v1183_v38 = vrot.slane %v1181_v34, 1  ;;  %v1386_v49 = vrot.slane %v1734_v47, 1 }
 0x216   : > { %v1178_v36 = vrot.slane %v1176_v33, 1  ;;  %v1388_v51 = vsel %vm483_vm3, %v1386_v49, %v1387_v50 }
 0x218   : > { %v1179_v37 = vor.u32 %v1178_v36, %v1174_v35 }
 0x21a   : > { %v1184_v28 = vsel %vm325_vm1, %v1179_v37, %v1183_v38 }
 0x21b   : > { %1846 = vmatmul.mubr.bf16.vlgmr.msra.gmra.mxu0 %v1184_v28 }
 0x21c   : > { %1870 = vmatpush3.bf16.msra.mxu0 %v2008_v39  ;;  %1885 = vmatprep.mubr.msk.bf16.mxu0 %vm2026_vm0, %v2025_v1 }
 0x21d   : > { %1871 = vmatprep.subr.bf16.mxu0 %v2025_v1 }
 0x220   : > { %1872 = vmatpush3.bf16.msra.mxu0 %v2009_v40 }
 0x221   : > { %1873 = vmatprep.subr.bf16.mxu0 %v2025_v1 }
 0x224   : > { %1874 = vmatpush3.bf16.msra.mxu0 %v2010_v41 }
 0x225   : > { %1875 = vmatprep.subr.bf16.mxu0 %v2025_v1 }
 0x228   : > { %1876 = vmatpush3.bf16.msra.mxu0 %v2011_v42 }
 0x229   : > { %1877 = vmatprep.subr.bf16.mxu0 %v2025_v1 }
 0x22c   : > { %1878 = vmatpush3.bf16.msra.mxu0 %v2012_v43 }
 0x22d   : > { %1879 = vmatprep.subr.bf16.mxu0 %v2025_v1 }
 0x230   : > { %1880 = vmatpush3.bf16.msra.mxu0 %v2013_v44 }
 0x231   : > { %1881 = vmatprep.subr.bf16.mxu0 %v2025_v1 }
 0x234   : > { %1882 = vmatpush3.bf16.msra.mxu0 %v2014_v45 }
 0x235   : > { %1883 = vmatprep.subr.bf16.mxu0 %v2025_v1  ;;  %v1743_v1 = vld [vmem:[%s2454_s6] ss:$0 sm:$0xff] }
 0x238   : > { %1884 = vmatpush3.bf16.msra.mxu0 %v2015_v48 }
 0x23b   : > { %1886 = vmatmul.mubr.bf16.vlgmr.msra.gmra.mxu0 %v1388_v51 }
 0x2d4   : > { %v1358_v52 = vpop.f32.mrf.mxu1 }
 0x2d6   : > { %v1867_v53 = vpop.f32.mrf.mxu1 }
 0x2d8   : > { %v1361_v54 = vpop.f32.mrf.mxu1 }
 0x2da   : > { %v1868_v55 = vpop.f32.mrf.mxu1 }
 0x2db   : > { %v1268_v56 = vpop.f32.mrf.mxu0 }
 0x2dc   : > { %v1359_v60 = vadd.f32 %v1358_v52, %v1268_v56 }
 0x2dd   : > { %v1847_v57 = vpop.f32.mrf.mxu0 }
 0x2df   : > { %v1271_v58 = vpop.f32.mrf.mxu0 }
 0x2e0   : > { %v1362_v0 = vadd.f32 %v1361_v54, %v1271_v58 }
 0x2e1   : > { %v1848_v59 = vpop.f32.mrf.mxu0 }
 0x2fb   : > { %v1472_v62 = vpop.f32.mrf.mxu0 }
 0x2fc   : > { %v1479_v63 = vadd.f32 %v1472_v62, %v1359_v60 }
 0x2fd   : > { %v1887_v61 = vpop.f32.mrf.mxu0 }
 0x2fe   : > { %v1488_v2 = vadd.f32 %v1743_v1, %v1479_v63 }
 0x2ff   : > { %v1475_v3 = vpop.f32.mrf.mxu0 }
 0x300   : > { %vm1490_vm0 = vcmp.ge.f32.partialorder %v1488_v2, 0.0  ;;  %v1492_v4 = vmul.f32 0.1, %v1488_v2  ;;  %v1480_v5 = vadd.f32 %v1475_v3, %v1362_v0 }
 0x301   : > { %v1888_v6 = vpop.f32.mrf.mxu0 }
 0x302   : > { %v1494_v7 = vsel %vm1490_vm0, %v1488_v2, %v1492_v4  ;;  %v1489_v8 = vadd.f32 %v1743_v1, %v1480_v5 }
 0x303   : > { %1496 = vst [vmem:[%s2395_s19] sm:$0xff] %v1494_v7 }
 0x304   : > { %vm1491_vm1 = vcmp.ge.f32.partialorder %v1489_v8, 0.0  ;;  %v1493_v9 = vmul.f32 0.1, %v1489_v8 }
 0x306   : > { %v1495_v10 = vsel %vm1491_vm1, %v1489_v8, %v1493_v9 }
 0x307   : > { %1497 = vst [vmem:[%s2395_s19 + $0x8] sm:$0xff] %v1495_v10 }
 0x308 PF: > { %s17_s24 = sadd.s32 1, %s2023_s24  }
 0x309   : > { %p14_p4 = scmp.ge.s32.totalorder %s17_s24, 4  }
 0x30b   :  { %16 = sbr.rel (!%p14_p4) target bundleno = 1 (0x1), region = 85 }

</bundles_post_ra>
